<compile_context>
chip_gen: v5e
topology: v5e:2x2
jax: 0.10.0
libtpu: 0.0.40
codegen_flags: <defaults>
</compile_context>

<pallas_src>
import jax
import jax.numpy as jnp
from jax.experimental import pallas as pl
from jax.experimental.pallas import tpu as pltpu


def _round_up(n, m):
    return ((n + m - 1) // m) * m


def qnet_kernel(x_ref, w1_ref, b1_ref, w2_ref, b2_ref, w3_ref, b3_ref, o_ref):
    # x_ref: (TB, D_in) f32 ; w1/w2/biases/w3 row: f32 ; o_ref: (TB, 1) f32
    h1 = jnp.dot(x_ref[...], w1_ref[...],
                 preferred_element_type=jnp.float32)            # (TB, 128) MXU
    h1 = jnp.maximum(h1 + b1_ref[...], 0.0)                     # bias + ReLU (VPU)
    h2 = jnp.dot(h1, w2_ref[...],
                 preferred_element_type=jnp.float32)            # (TB, 64) MXU
    h2 = jnp.maximum(h2 + b2_ref[...], 0.0)
    # Final (64 -> 1) layer: VPU multiply + cross-lane reduce (XLU), no MXU pass.
    o = jnp.sum(h2 * w3_ref[...], axis=-1, keepdims=True) + b3_ref[...]
    o_ref[...] = o.astype(o_ref.dtype)


def _qnet_call(x, w1, b1, w2, b2, w3_row, b3_, tb):
    """x: (Bc, D_in) f32 with Bc % tb == 0 and tb % 8 == 0."""
    bc, d_in = x.shape
    num_tiles = bc // tb

    def resident(a):
        # Constant block index -> fetched once, stays VMEM-resident across the grid.
        return pl.BlockSpec(a.shape, lambda i: (0, 0))

    return pl.pallas_call(
        qnet_kernel,
        out_shape=jax.ShapeDtypeStruct((bc, 1), jnp.float32),
        grid=(num_tiles,),
        in_specs=[
            pl.BlockSpec((tb, d_in), lambda i: (i, 0)),   # x: streamed & pipelined
            resident(w1), resident(b1),
            resident(w2), resident(b2),
            resident(w3_row), resident(b3_),
        ],
        out_specs=pl.BlockSpec((tb, 1), lambda i: (i, 0)),
        compiler_params=pltpu.CompilerParams(
            dimension_semantics=("parallel",),
        ),
    )(x, w1, b1, w2, b2, w3_row, b3_)


def qnet_forward(x, params, *, block_b=8192):
    """x: (B, feature_dim + act_dim) float32 -> (B, 1) float32."""
    w1, b1, w2, b2, w3, b3 = params
    B, d_in = x.shape

    x = x.astype(jnp.float32)
    # Normalize parameter shapes (accepts PyTorch-style (fo,) biases / (64, 1) w3).
    w1 = jnp.asarray(w1, jnp.float32)
    w2 = jnp.asarray(w2, jnp.float32)
    b1_ = jnp.asarray(b1, jnp.float32).reshape(1, -1)      # (1, 128)
    b2_ = jnp.asarray(b2, jnp.float32).reshape(1, -1)      # (1, 64)
    w3_row = jnp.asarray(w3, jnp.float32).reshape(1, -1)   # (1, 64), VPU/XLU path
    b3_ = jnp.asarray(b3, jnp.float32).reshape(1, 1)       # (1, 1)

    # Batch tile: large (amortize grid-step overhead), multiple of 8 (sublanes).
    tb = _round_up(min(block_b, _round_up(B, 8)), 8)

    outs = []
    b_main = (B // tb) * tb
    if b_main > 0:
        outs.append(_qnet_call(x[:b_main], w1, b1_, w2, b2_, w3_row, b3_, tb))

    rem = B - b_main
    if rem > 0:
        # Ragged tail: one extra small call; pad at most 7 rows (not the full x).
        tail_tb = _round_up(rem, 8)
        x_tail = x[b_main:]
        if tail_tb != rem:
            x_tail = jnp.pad(x_tail, ((0, tail_tb - rem), (0, 0)))
        tail_out = _qnet_call(x_tail, w1, b1_, w2, b2_, w3_row, b3_, tail_tb)
        outs.append(tail_out[:rem])

    return outs[0] if len(outs) == 1 else jnp.concatenate(outs, axis=0)


def init_params(key, feature_dim, act_dim):
    """Deterministic init mirroring nn.Linear's U(-1/sqrt(fan_in), 1/sqrt(fan_in)).

    Weights are stored (fan_in, fan_out); biases are PyTorch-shaped (fan_out,).
    """
    d_in = feature_dim + act_dim
    dims = [(d_in, 128), (128, 64), (64, 1)]
    params = []
    keys = jax.random.split(key, 2 * len(dims))
    for i, (fi, fo) in enumerate(dims):
        bound = 1.0 / jnp.sqrt(jnp.float32(fi))
        w = jax.random.uniform(keys[2 * i], (fi, fo), jnp.float32, -bound, bound)
        b = jax.random.uniform(keys[2 * i + 1], (fo,), jnp.float32, -bound, bound)
        params += [w, b]
    return tuple(params)


if __name__ == "__main__":
    feature_dim, act_dim, batch = 24, 8, 8
    key = jax.random.PRNGKey(0)
    k_x, k_p = jax.random.split(key)

    x = jax.random.normal(k_x, (batch, feature_dim + act_dim), jnp.float32)
    params = init_params(k_p, feature_dim, act_dim)

    out = qnet_forward(x, params)
    jax.block_until_ready(out)
    assert out.shape == (batch, 1)

    # Pure f32 reference of the module (kernel is f32 end-to-end; tolerance only
    # covers possible MXU-internal precision differences vs. XLA's dot).
    w1, b1, w2, b2, w3, b3 = params
    ref = jnp.maximum(x @ w1 + b1, 0.0)
    ref = jnp.maximum(ref @ w2 + b2, 0.0)
    ref = ref @ w3 + b3
    assert jnp.allclose(out, ref, atol=2e-2, rtol=2e-2), (
        float(jnp.max(jnp.abs(out - ref))))

    print("KERNEL_OK")
</pallas_src>

<mosaic_0001>
module attributes {stable_mosaic.version = 11 : i64} {
  func.func @qnet_kernel(%arg0: i32, %arg1: memref<8x32xf32, #tpu.memory_space<vmem>>, %arg2: memref<32x128xf32, #tpu.memory_space<vmem>>, %arg3: memref<1x128xf32, #tpu.memory_space<vmem>>, %arg4: memref<128x64xf32, #tpu.memory_space<vmem>>, %arg5: memref<1x64xf32, #tpu.memory_space<vmem>>, %arg6: memref<1x64xf32, #tpu.memory_space<vmem>>, %arg7: memref<1x1xf32, #tpu.memory_space<vmem>>, %arg8: memref<8x1xf32, #tpu.memory_space<vmem>>) attributes {dimension_semantics = [#tpu.dimension_semantics<parallel>], iteration_bounds = array<i64: 1>, scalar_prefetch = 0 : i64, scratch_operands = 0 : i64, tpu.core_type = #tpu.core_type<tc>, window_params = [{transform_indices = @transform_0, window_bounds = array<i64: 8, 32>}, {pipeline_mode = #tpu.pipeline_mode<synchronous>, transform_indices = @transform_1, window_bounds = array<i64: 32, 128>}, {pipeline_mode = #tpu.pipeline_mode<synchronous>, transform_indices = @transform_2, window_bounds = array<i64: 1, 128>}, {pipeline_mode = #tpu.pipeline_mode<synchronous>, transform_indices = @transform_3, window_bounds = array<i64: 128, 64>}, {pipeline_mode = #tpu.pipeline_mode<synchronous>, transform_indices = @transform_4, window_bounds = array<i64: 1, 64>}, {pipeline_mode = #tpu.pipeline_mode<synchronous>, transform_indices = @transform_5, window_bounds = array<i64: 1, 64>}, {pipeline_mode = #tpu.pipeline_mode<synchronous>, transform_indices = @transform_6, window_bounds = array<i64: 1, 1>}, {transform_indices = @transform_7, window_bounds = array<i64: 8, 1>}]} {
    %c0 = arith.constant 0 : index
    %c0_0 = arith.constant 0 : index
    %0 = vector.load %arg1[%c0, %c0_0] : memref<8x32xf32, #tpu.memory_space<vmem>>, vector<8x32xf32>
    %c0_1 = arith.constant 0 : index
    %c0_2 = arith.constant 0 : index
    %1 = vector.load %arg2[%c0_1, %c0_2] : memref<32x128xf32, #tpu.memory_space<vmem>>, vector<32x128xf32>
    %cst = arith.constant dense<0.000000e+00> : vector<8x128xf32>
    %2 = tpu.matmul %0, %1, %cst {dimension_numbers = #tpu.dot_dimension_numbers<[1], [0], [0], [1], [0, 0, 1, 1], [], []>} : vector<8x32xf32>, vector<32x128xf32>, vector<8x128xf32> -> vector<8x128xf32>
    %c0_3 = arith.constant 0 : index
    %c0_4 = arith.constant 0 : index
    %3 = vector.load %arg3[%c0_3, %c0_4] : memref<1x128xf32, #tpu.memory_space<vmem>>, vector<1x128xf32>
    %4 = vector.broadcast %3 : vector<1x128xf32> to vector<8x128xf32>
    %5 = arith.addf %2, %4 : vector<8x128xf32>
    %cst_5 = arith.constant 0.000000e+00 : f32
    %6 = vector.broadcast %cst_5 : f32 to vector<8x128xf32>
    %7 = arith.maximumf %5, %6 : vector<8x128xf32>
    %c0_6 = arith.constant 0 : index
    %c0_7 = arith.constant 0 : index
    %8 = vector.load %arg4[%c0_6, %c0_7] : memref<128x64xf32, #tpu.memory_space<vmem>>, vector<128x64xf32>
    %cst_8 = arith.constant dense<0.000000e+00> : vector<8x64xf32>
    %9 = tpu.matmul %7, %8, %cst_8 {dimension_numbers = #tpu.dot_dimension_numbers<[1], [0], [0], [1], [0, 0, 1, 1], [], []>} : vector<8x128xf32>, vector<128x64xf32>, vector<8x64xf32> -> vector<8x64xf32>
    %c0_9 = arith.constant 0 : index
    %c0_10 = arith.constant 0 : index
    %10 = vector.load %arg5[%c0_9, %c0_10] : memref<1x64xf32, #tpu.memory_space<vmem>>, vector<1x64xf32>
    %11 = vector.broadcast %10 : vector<1x64xf32> to vector<8x64xf32>
    %12 = arith.addf %9, %11 : vector<8x64xf32>
    %cst_11 = arith.constant 0.000000e+00 : f32
    %13 = vector.broadcast %cst_11 : f32 to vector<8x64xf32>
    %14 = arith.maximumf %12, %13 : vector<8x64xf32>
    %c0_12 = arith.constant 0 : index
    %c0_13 = arith.constant 0 : index
    %15 = vector.load %arg6[%c0_12, %c0_13] : memref<1x64xf32, #tpu.memory_space<vmem>>, vector<1x64xf32>
    %16 = vector.broadcast %15 : vector<1x64xf32> to vector<8x64xf32>
    %17 = arith.mulf %14, %16 : vector<8x64xf32>
    %cst_14 = arith.constant dense<0.000000e+00> : vector<8xf32>
    %18 = vector.multi_reduction <add>, %17, %cst_14 [1] : vector<8x64xf32> to vector<8xf32>
    %19 = vector.shape_cast %18 : vector<8xf32> to vector<8x1xf32>
    %c0_15 = arith.constant 0 : index
    %c0_16 = arith.constant 0 : index
    %20 = vector.load %arg7[%c0_15, %c0_16] : memref<1x1xf32, #tpu.memory_space<vmem>>, vector<1x1xf32>
    %21 = vector.broadcast %20 : vector<1x1xf32> to vector<8x1xf32>
    %22 = arith.addf %19, %21 : vector<8x1xf32>
    %c0_17 = arith.constant 0 : index
    %c0_18 = arith.constant 0 : index
    %23 = vector.load %arg8[%c0_17, %c0_18] : memref<8x1xf32, #tpu.memory_space<vmem>>, vector<8x1xf32>
    tpu.vector_store %arg8[%c0_17, %c0_18], %22 {strides = array<i32>} : memref<8x1xf32, #tpu.memory_space<vmem>>, vector<8x1xf32>,
    return
  }
  func.func @transform_0(%arg0: i32) -> (i32, i32) {
    %c0_i32 = arith.constant 0 : i32
    %c0_i32_0 = arith.constant 0 : i32
    return %arg0, %c0_i32 : i32, i32
  }
  func.func @transform_1(%arg0: i32) -> (i32, i32) {
    %c0_i32 = arith.constant 0 : i32
    %c0_i32_0 = arith.constant 0 : i32
    %c0_i32_1 = arith.constant 0 : i32
    return %c0_i32, %c0_i32_0 : i32, i32
  }
  func.func @transform_2(%arg0: i32) -> (i32, i32) {
    %c0_i32 = arith.constant 0 : i32
    %c0_i32_0 = arith.constant 0 : i32
    %c0_i32_1 = arith.constant 0 : i32
    return %c0_i32, %c0_i32_0 : i32, i32
  }
  func.func @transform_3(%arg0: i32) -> (i32, i32) {
    %c0_i32 = arith.constant 0 : i32
    %c0_i32_0 = arith.constant 0 : i32
    %c0_i32_1 = arith.constant 0 : i32
    return %c0_i32, %c0_i32_0 : i32, i32
  }
  func.func @transform_4(%arg0: i32) -> (i32, i32) {
    %c0_i32 = arith.constant 0 : i32
    %c0_i32_0 = arith.constant 0 : i32
    %c0_i32_1 = arith.constant 0 : i32
    return %c0_i32, %c0_i32_0 : i32, i32
  }
  func.func @transform_5(%arg0: i32) -> (i32, i32) {
    %c0_i32 = arith.constant 0 : i32
    %c0_i32_0 = arith.constant 0 : i32
    %c0_i32_1 = arith.constant 0 : i32
    return %c0_i32, %c0_i32_0 : i32, i32
  }
  func.func @transform_6(%arg0: i32) -> (i32, i32) {
    %c0_i32 = arith.constant 0 : i32
    %c0_i32_0 = arith.constant 0 : i32
    %c0_i32_1 = arith.constant 0 : i32
    return %c0_i32, %c0_i32_0 : i32, i32
  }
  func.func @transform_7(%arg0: i32) -> (i32, i32) {
    %c0_i32 = arith.constant 0 : i32
    %c0_i32_0 = arith.constant 0 : i32
    return %arg0, %c0_i32 : i32, i32
  }
}

</mosaic_0001>

<bundles_post_ra>
// kernel: tpu_custom_call.1
= control target key start
LH: loop header
LB: loop body
LE: loop exit
PB: predicated region body
PF: predicated region fallthrough
CT: control target
= control target key end

     0   :  { %vm37_vm0 = vcmask 261120   ;;  %vm108_vm1 = vcmask 523264   ;;  %vm117_vm2 = vcmask 7168   ;;  %s246_s1 = inlined_call_operand.vmem [shape: f32[32,128], index: 1, kind: input, shape index: {}]   ;;  %s247_s3 = inlined_call_operand.vmem [shape: f32[128,64], index: 3, kind: input, shape index: {}]   ;;  %s248_s0 = inlined_call_operand.vmem [shape: f32[8,32], index: 0, kind: input, shape index: {}]   ;;  %s249_s2 = inlined_call_operand.vmem [shape: f32[1,128], index: 2, kind: input, shape index: {}]   ;;  %s250_s4 = inlined_call_operand.vmem [shape: f32[1,64], index: 4, kind: input, shape index: {}]   ;;  %s251_s5 = inlined_call_operand.vmem [shape: f32[1,64], index: 5, kind: input, shape index: {}]   ;;  %s252_s6 = inlined_call_operand.<no memory space> [shape: f32[1,1], index: 6, kind: input, shape index: {}]   ;;  %s253_s7 = inlined_call_operand.vmem [shape: f32[8,1], index: 7, kind: output, shape index: {}]  }
   0x1   :  { %v32_v0 = vld [vmem:[%s246_s1 + $0x18] sm:$0xff]  ;;  %v31_v1 = vld [vmem:[%s246_s1 + $0x10] sm:$0xff]  ;;  %v30_v3 = vld [vmem:[%s246_s1 + $0x8] sm:$0xff]  ;;  %v12_v25 = vstv %s252_s6 }
   0x2   :  { %53 = vmatpush.msra.mxu0 %v32_v0  ;;  %v77_v2 = vld [vmem:[%s247_s3 + $0x78] sm:$0xff]  ;;  %v76_v4 = vld [vmem:[%s247_s3 + $0x70] sm:$0xff]  ;;  %v75_v5 = vld [vmem:[%s247_s3 + $0x68] sm:$0xff]  ;;  %13 = vst [vmem:[#allocation2] sm:$0x1] %v12_v25 }
   0x3   :  { %82 = vmatpush.msra.mxu1 %v77_v2  ;;  %v29_v6 = vld [vmem:[%s246_s1] sm:$0xff]  ;;  %v73_v9 = vld [vmem:[%s247_s3 + $0x58] sm:$0xff]  ;;  %v72_v10 = vld [vmem:[%s247_s3 + $0x50] sm:$0xff] }
   0x4   :  { %54 = vmatpush.msra.mxu0 %v31_v1  ;;  %v28_v7 = vld [vmem:[%s248_s0] sm:$0xff]  ;;  %v71_v11 = vld [vmem:[%s247_s3 + $0x48] sm:$0xff]  ;;  %v69_v13 = vld [vmem:[%s247_s3 + $0x38] sm:$0xff] }
   0x5   :  { %83 = vmatpush.msra.mxu1 %v76_v4  ;;  %v74_v8 = vld [vmem:[%s247_s3 + $0x60] sm:$0xff]  ;;  %v68_v14 = vld [vmem:[%s247_s3 + $0x30] sm:$0xff]  ;;  %v67_v15 = vld [vmem:[%s247_s3 + $0x28] sm:$0xff] }
   0x6   :  { %55 = vmatpush.msra.mxu0 %v30_v3  ;;  %v70_v12 = vld [vmem:[%s247_s3 + $0x40] sm:$0xff]  ;;  %v65_v17 = vld [vmem:[%s247_s3 + $0x18] sm:$0xff]  ;;  %v64_v18 = vld [vmem:[%s247_s3 + $0x10] sm:$0xff] }
   0x7   :  { %84 = vmatpush.msra.mxu1 %v75_v5  ;;  %v66_v16 = vld [vmem:[%s247_s3 + $0x20] sm:$0xff]  ;;  %v63_v19 = vld [vmem:[%s247_s3 + $0x8] sm:$0xff] }
   0x8   :  { %56 = vmatpush.msra.mxu0 %v29_v6  ;;  %v62_v20 = vld [vmem:[%s247_s3] sm:$0xff] }
   0x9   :  { %123 = vmatmul.msk.f32.vlgmr.msra.gmra.mxu0 %vm37_vm0, %v28_v7  ;;  %85 = vmatpush.msra.mxu1 %v74_v8  ;;  %v124_v21 = vld [vmem:[%s249_s2] ss:$0 sm:$0xff] }
   0xa   :  { %v125_v26 = vld [vmem:[%s250_s4] ss:$0 sm:$0xff] }
   0xb   :  { %86 = vmatpush.msra.mxu1 %v73_v9  ;;  %v126_v29 = vld [vmem:[%s251_s5] ss:$0 sm:$0xff] }
   0xc   :  { %v127_v33 = vld [vmem:[#allocation2] ss:$0 sm:$0xff] }
   0xd   :  { %87 = vmatpush.msra.mxu1 %v72_v10 }
   0xf   :  { %88 = vmatpush.msra.mxu1 %v71_v11 }
  0x11   :  { %89 = vmatpush.msra.mxu1 %v70_v12 }
  0x13   :  { %90 = vmatpush.msra.mxu1 %v69_v13 }
  0x15   :  { %91 = vmatpush.msra.mxu1 %v68_v14 }
  0x17   :  { %92 = vmatpush.msra.mxu1 %v67_v15 }
  0x19   :  { %93 = vmatpush.msra.mxu1 %v66_v16 }
  0x1b   :  { %94 = vmatpush.msra.mxu1 %v65_v17 }
  0x1d   :  { %95 = vmatpush.msra.mxu1 %v64_v18 }
  0x1f   :  { %96 = vmatpush.msra.mxu1 %v63_v19 }
  0x21   :  { %97 = vmatpush.msra.mxu1 %v62_v20 }
  0x86   :  { %v58_v22 = vpop.f32.mrf.mxu0 }
  0x87   :  { %v59_v23 = vadd.f32 %v124_v21, %v58_v22 }
  0x89   :  { %v61_v24 = vmax.f32 %v59_v23, 0.0 }
  0x8b   :  { %98 = vmatmul.f32.vlgmr.msra.gmra.mxu1 %v61_v24 }
 0x108   :  { %v99_v27 = vpop.f32.mrf.mxu1 }
 0x109   :  { %v100_v28 = vadd.f32 %v125_v26, %v99_v27 }
 0x10b   :  { %v102_v30 = vmax.f32 %v100_v28, 0.0 }
 0x10d   :  { %v107_v31 = vmul.f32 %v126_v29, %v102_v30 }
 0x10f   :  { %v109_v32 = vsel %vm108_vm1, %v107_v31, 0.0 }
 0x110   :  { %110 = vadd.xlane.f32.xlu0 %v109_v32 }
 0x183   :  { %v111_v34 = vpop.xlane.xlu0 %110 }
 0x184   :  { %v116_v35 = vadd.f32 %v127_v33, %v111_v34 }
 0x186   :  { %118 = vst.msk [vmem:[%s253_s7] sm:$0xff] %vm117_vm2, %v116_v35 }

</bundles_post_ra>
